<compile_context>
chip_gen: v5e
topology: v5e:2x2
jax: 0.10.0
libtpu: 0.0.40
codegen_flags: <defaults>
</compile_context>

<pallas_src>
import jax
import jax.numpy as jnp
from jax.experimental import pallas as pl
from jax.experimental.pallas import tpu as pltpu


def _bc_kernel(img_ref, w_full_ref, b01_ref, fc2_w_ref, fc2_b_ref, out_ref):
    # (GAP o encoder o fc1) folded into a single MXU matmul, f32 accumulation.
    h = jnp.dot(img_ref[...], w_full_ref[...],
                preferred_element_type=jnp.float32) + b01_ref[...]
    h = jnp.maximum(h, 0.0)                                            # ReLU
    # fc2 on the MXU; un-padded (tn, A) store (masked vst, hidden under DMA).
    out_ref[...] = (jnp.dot(h, fc2_w_ref[...],
                            preferred_element_type=jnp.float32)
                    + fc2_b_ref[...]).astype(out_ref.dtype)


def _vmem_capacity_bytes():
    try:
        return int(pltpu.get_tpu_info().vmem_capacity_bytes)
    except Exception:
        return 64 * 1024 * 1024  # conservative fallback (v7x per-TC VMEM)


def bc_forward(images, params, *, interpret=False):
    """images: (B, T, 3, H, W) float32 (NCHW per frame, PyTorch convention).

    Returns (out, aux) with out: (B, T, action_space), matching BCModel.forward.
    """
    B, T, C, H, W = images.shape
    N = B * T
    HW = H * W
    CHW = C * HW

    # No dtype cast in the wrapper: transport in the caller's dtype (f32 here).
    x = images.reshape(N, CHW)

    f32 = jnp.float32
    enc_w = params["enc_w"].astype(f32)   # (C, enc_dim)
    enc_b = params["enc_b"].astype(f32)   # (1, enc_dim)
    fc1_w = params["fc1_w"].astype(f32)   # (enc_dim, h_dim) == fc1.weight.T
    fc1_b = params["fc1_b"].astype(f32)   # (1, h_dim)
    fc2_w = params["fc2_w"].astype(f32)   # (h_dim, A)       == fc2.weight.T
    fc2_b = params["fc2_b"].astype(f32)   # (1, A)

    h_dim = fc1_w.shape[-1]
    A = fc2_w.shape[-1]

    # Fold encoder projection + 1/HW global-average-pool into fc1, then expand
    # the per-channel weights over each channel's HW columns so the whole
    # chain becomes one (N, CHW) @ (CHW, h_dim) MXU matmul.
    # TODO(synk): for very large CHW * h_dim (e.g. 256x256 images, h_dim=512)
    # this resident weight would need K-tiling / bf16 storage.
    w01 = (enc_w @ fc1_w) * (1.0 / HW)    # (C, h_dim)
    b01 = enc_b @ fc1_w + fc1_b           # (1, h_dim)
    w_full = jnp.repeat(w01, HW, axis=0)  # (CHW, h_dim)
    if x.dtype == jnp.bfloat16:           # only if the caller already has bf16
        w_full = w_full.astype(jnp.bfloat16)

    # Generation-aware VMEM budget: stay well under per-core capacity
    # (v7x 64 MiB, v5e/v6e 128 MiB); size the double-buffered image tile from
    # what is left after the VMEM-resident weights plus headroom.
    vmem_cap = _vmem_capacity_bytes()
    vmem_limit = int(min(vmem_cap - 8 * 1024 * 1024, (vmem_cap * 85) // 100))
    weight_bytes = (w_full.size * w_full.dtype.itemsize
                    + (b01.size + fc2_w.size + fc2_b.size) * 4)
    row_bytes = CHW * x.dtype.itemsize
    img_budget = vmem_limit - 2 * weight_bytes - 4 * 1024 * 1024
    img_budget = max(img_budget, 2 * 8 * row_bytes)

    tn = max(8, (img_budget // (2 * row_bytes) // 8) * 8)   # no artificial cap
    if N >= 64:
        # keep >= 8 grid steps so v7x's 2 TensorCores each get >= 4 steps
        tn = min(tn, max(8, (N // 8 // 8) * 8))
    if tn >= N:
        tn = N                                              # single full block
    grid = (pl.cdiv(N, tn),)

    out = pl.pallas_call(
        _bc_kernel,
        out_shape=jax.ShapeDtypeStruct((N, A), f32),
        grid=grid,
        in_specs=[
            pl.BlockSpec((tn, CHW), lambda i: (i, 0)),     # pipelined image tiles
            pl.BlockSpec((CHW, h_dim), lambda i: (0, 0)),  # VMEM-resident weights
            pl.BlockSpec((1, h_dim), lambda i: (0, 0)),
            pl.BlockSpec((h_dim, A), lambda i: (0, 0)),
            pl.BlockSpec((1, A), lambda i: (0, 0)),
        ],
        out_specs=pl.BlockSpec((tn, A), lambda i: (i, 0)),  # un-padded output
        compiler_params=pltpu.CompilerParams(
            dimension_semantics=("parallel",),              # megacore-shard N
            vmem_limit_bytes=vmem_limit,
        ),
        interpret=interpret,
    )(x, w_full, b01, fc2_w, fc2_b)

    out = out.reshape(B, T, A)
    # NormalizeActions statistics are returned (not applied), matching forward().
    return out, {"act_mean": params["act_mean"], "act_std": params["act_std"]}


def init_params(key, c_in=3, enc_dim=64, h_dim=32, action_space=4):
    ks = jax.random.split(key, 6)

    def uni(k, shape, fan_in):
        bound = 1.0 / jnp.sqrt(fan_in)
        return jax.random.uniform(k, shape, jnp.float32, -bound, bound)

    return {
        # synthetic encoder projection (stand-in for the injected encoder)
        "enc_w": uni(ks[0], (c_in, enc_dim), c_in),
        "enc_b": uni(ks[1], (1, enc_dim), c_in),
        # fc1: nn.Linear(enc_dim, h_dim)  (stored transposed: (in, out))
        "fc1_w": uni(ks[2], (enc_dim, h_dim), enc_dim),
        "fc1_b": uni(ks[3], (1, h_dim), enc_dim),
        # fc2: nn.Linear(h_dim, action_space)
        "fc2_w": uni(ks[4], (h_dim, action_space), h_dim),
        "fc2_b": uni(ks[5], (1, action_space), h_dim),
        # NormalizeActions statistics (identity normalization)
        "act_mean": jnp.zeros((action_space,), jnp.float32),
        "act_std": jnp.ones((action_space,), jnp.float32),
    }


if __name__ == "__main__":
    key = jax.random.PRNGKey(0)
    k_img, k_param = jax.random.split(key)

    B, T, C, H, W = 2, 2, 3, 16, 16
    enc_dim, h_dim, A = 64, 32, 4
    images = jax.random.normal(k_img, (B, T, C, H, W), jnp.float32)
    params = init_params(k_param, c_in=C, enc_dim=enc_dim, h_dim=h_dim,
                         action_space=A)

    out, aux = bc_forward(images, params)
    out = jax.block_until_ready(out)

    assert out.shape == (B, T, A), out.shape
    assert out.dtype == jnp.float32
    assert aux["act_mean"].shape == (A,)

    # Plain-JAX reference of the same forward pass (f32, highest matmul precision).
    hp = jax.lax.Precision.HIGHEST
    feat = images.reshape(B * T, C, H * W).mean(-1)
    enc = jnp.dot(feat, params["enc_w"], precision=hp) + params["enc_b"]
    hid = jnp.maximum(jnp.dot(enc, params["fc1_w"], precision=hp)
                      + params["fc1_b"], 0.0)
    ref = (jnp.dot(hid, params["fc2_w"], precision=hp)
           + params["fc2_b"]).reshape(B, T, A)
    assert jnp.allclose(out, ref, atol=5e-3, rtol=5e-3), \
        float(jnp.max(jnp.abs(out - ref)))

    print("KERNEL_OK")
</pallas_src>

<mosaic_0001>
module attributes {stable_mosaic.version = 11 : i64} {
  func.func @_bc_kernel(%arg0: i32, %arg1: memref<4x768xf32, #tpu.memory_space<vmem>>, %arg2: memref<768x32xf32, #tpu.memory_space<vmem>>, %arg3: memref<1x32xf32, #tpu.memory_space<vmem>>, %arg4: memref<32x4xf32, #tpu.memory_space<vmem>>, %arg5: memref<1x4xf32, #tpu.memory_space<vmem>>, %arg6: memref<4x4xf32, #tpu.memory_space<vmem>>) attributes {dimension_semantics = [#tpu.dimension_semantics<parallel>], iteration_bounds = array<i64: 1>, scalar_prefetch = 0 : i64, scratch_operands = 0 : i64, tpu.core_type = #tpu.core_type<tc>, window_params = [{transform_indices = @transform_0, window_bounds = array<i64: 4, 768>}, {pipeline_mode = #tpu.pipeline_mode<synchronous>, transform_indices = @transform_1, window_bounds = array<i64: 768, 32>}, {pipeline_mode = #tpu.pipeline_mode<synchronous>, transform_indices = @transform_2, window_bounds = array<i64: 1, 32>}, {pipeline_mode = #tpu.pipeline_mode<synchronous>, transform_indices = @transform_3, window_bounds = array<i64: 32, 4>}, {pipeline_mode = #tpu.pipeline_mode<synchronous>, transform_indices = @transform_4, window_bounds = array<i64: 1, 4>}, {transform_indices = @transform_5, window_bounds = array<i64: 4, 4>}]} {
    %c0 = arith.constant 0 : index
    %c0_0 = arith.constant 0 : index
    %0 = vector.load %arg1[%c0, %c0_0] : memref<4x768xf32, #tpu.memory_space<vmem>>, vector<4x768xf32>
    %c0_1 = arith.constant 0 : index
    %c0_2 = arith.constant 0 : index
    %1 = vector.load %arg2[%c0_1, %c0_2] : memref<768x32xf32, #tpu.memory_space<vmem>>, vector<768x32xf32>
    %cst = arith.constant dense<0.000000e+00> : vector<4x32xf32>
    %2 = tpu.matmul %0, %1, %cst {dimension_numbers = #tpu.dot_dimension_numbers<[1], [0], [0], [1], [0, 0, 1, 1], [], []>} : vector<4x768xf32>, vector<768x32xf32>, vector<4x32xf32> -> vector<4x32xf32>
    %c0_3 = arith.constant 0 : index
    %c0_4 = arith.constant 0 : index
    %3 = vector.load %arg3[%c0_3, %c0_4] : memref<1x32xf32, #tpu.memory_space<vmem>>, vector<1x32xf32>
    %4 = vector.broadcast %3 : vector<1x32xf32> to vector<4x32xf32>
    %5 = arith.addf %2, %4 : vector<4x32xf32>
    %cst_5 = arith.constant 0.000000e+00 : f32
    %6 = vector.broadcast %cst_5 : f32 to vector<4x32xf32>
    %7 = arith.maximumf %5, %6 : vector<4x32xf32>
    %c0_6 = arith.constant 0 : index
    %c0_7 = arith.constant 0 : index
    %8 = vector.load %arg4[%c0_6, %c0_7] : memref<32x4xf32, #tpu.memory_space<vmem>>, vector<32x4xf32>
    %cst_8 = arith.constant dense<0.000000e+00> : vector<4x4xf32>
    %9 = tpu.matmul %7, %8, %cst_8 {dimension_numbers = #tpu.dot_dimension_numbers<[1], [0], [0], [1], [0, 0, 1, 1], [], []>} : vector<4x32xf32>, vector<32x4xf32>, vector<4x4xf32> -> vector<4x4xf32>
    %c0_9 = arith.constant 0 : index
    %c0_10 = arith.constant 0 : index
    %10 = vector.load %arg5[%c0_9, %c0_10] : memref<1x4xf32, #tpu.memory_space<vmem>>, vector<1x4xf32>
    %11 = vector.broadcast %10 : vector<1x4xf32> to vector<4x4xf32>
    %12 = arith.addf %9, %11 : vector<4x4xf32>
    %c0_11 = arith.constant 0 : index
    %c0_12 = arith.constant 0 : index
    %13 = vector.load %arg6[%c0_11, %c0_12] : memref<4x4xf32, #tpu.memory_space<vmem>>, vector<4x4xf32>
    tpu.vector_store %arg6[%c0_11, %c0_12], %12 {strides = array<i32>} : memref<4x4xf32, #tpu.memory_space<vmem>>, vector<4x4xf32>,
    return
  }
  func.func @transform_0(%arg0: i32) -> (i32, i32) {
    %c0_i32 = arith.constant 0 : i32
    %c0_i32_0 = arith.constant 0 : i32
    return %arg0, %c0_i32 : i32, i32
  }
  func.func @transform_1(%arg0: i32) -> (i32, i32) {
    %c0_i32 = arith.constant 0 : i32
    %c0_i32_0 = arith.constant 0 : i32
    %c0_i32_1 = arith.constant 0 : i32
    return %c0_i32, %c0_i32_0 : i32, i32
  }
  func.func @transform_2(%arg0: i32) -> (i32, i32) {
    %c0_i32 = arith.constant 0 : i32
    %c0_i32_0 = arith.constant 0 : i32
    %c0_i32_1 = arith.constant 0 : i32
    return %c0_i32, %c0_i32_0 : i32, i32
  }
  func.func @transform_3(%arg0: i32) -> (i32, i32) {
    %c0_i32 = arith.constant 0 : i32
    %c0_i32_0 = arith.constant 0 : i32
    %c0_i32_1 = arith.constant 0 : i32
    return %c0_i32, %c0_i32_0 : i32, i32
  }
  func.func @transform_4(%arg0: i32) -> (i32, i32) {
    %c0_i32 = arith.constant 0 : i32
    %c0_i32_0 = arith.constant 0 : i32
    %c0_i32_1 = arith.constant 0 : i32
    return %c0_i32, %c0_i32_0 : i32, i32
  }
  func.func @transform_5(%arg0: i32) -> (i32, i32) {
    %c0_i32 = arith.constant 0 : i32
    %c0_i32_0 = arith.constant 0 : i32
    return %arg0, %c0_i32 : i32, i32
  }
}

</mosaic_0001>

<bundles_post_ra>
// kernel: tpu_custom_call.1
= control target key start
LH: loop header
LB: loop body
LE: loop exit
PB: predicated region body
PF: predicated region fallthrough
CT: control target
= control target key end

     0   :  { %s694_s0 = inlined_call_operand.vmem [shape: f32[4,768], index: 0, kind: input, shape index: {}]   ;;  %s695_s1 = inlined_call_operand.vmem [shape: f32[768,32], index: 1, kind: input, shape index: {}]   ;;  %s696_s2 = inlined_call_operand.vmem [shape: f32[1,32], index: 2, kind: input, shape index: {}]   ;;  %s697_s3 = inlined_call_operand.vmem [shape: f32[32,4], index: 3, kind: input, shape index: {}]   ;;  %s698_s4 = inlined_call_operand.vmem [shape: f32[1,4], index: 4, kind: input, shape index: {}]   ;;  %s699_s5 = inlined_call_operand.hbm [shape: f32[4,4], index: 5, kind: output, shape index: {}]  }
   0x1   :  { %v39_v0 = vld [vmem:[%s695_s1 + $0x78] sm:$0xff]  ;;  %v38_v1 = vld [vmem:[%s695_s1 + $0x70] sm:$0xff]  ;;  %v37_v4 = vld [vmem:[%s695_s1 + $0x68] sm:$0xff] }
   0x2   :  { %v55_v2 = vld [vmem:[%s695_s1 + $0xf8] sm:$0xff]  ;;  %144 = vmatpush.msra.mxu0 %v39_v0  ;;  %v54_v3 = vld [vmem:[%s695_s1 + $0xf0] sm:$0xff]  ;;  %v53_v5 = vld [vmem:[%s695_s1 + $0xe8] sm:$0xff] }
   0x3   :  { %164 = vmatpush.msra.mxu1 %v55_v2  ;;  %v36_v6 = vld [vmem:[%s695_s1 + $0x60] sm:$0xff]  ;;  %v35_v8 = vld [vmem:[%s695_s1 + $0x58] sm:$0xff]  ;;  %v34_v10 = vld [vmem:[%s695_s1 + $0x50] sm:$0xff] }
   0x4   :  { %145 = vmatpush.msra.mxu0 %v38_v1  ;;  %v52_v7 = vld [vmem:[%s695_s1 + $0xe0] sm:$0xff]  ;;  %v51_v9 = vld [vmem:[%s695_s1 + $0xd8] sm:$0xff]  ;;  %v50_v12 = vld [vmem:[%s695_s1 + $0xd0] sm:$0xff] }
   0x5   :  { %165 = vmatpush.msra.mxu1 %v54_v3  ;;  %v71_v11 = vld [vmem:[%s695_s1 + $0x178] sm:$0xff]  ;;  %v70_v13 = vld [vmem:[%s695_s1 + $0x170] sm:$0xff]  ;;  %v69_v15 = vld [vmem:[%s695_s1 + $0x168] sm:$0xff] }
   0x6   :  { %146 = vmatpush.msra.mxu0 %v37_v4  ;;  %184 = vmatpush.msra.mxu2 %v71_v11  ;;  %v87_v14 = vld [vmem:[%s695_s1 + $0x1f8] sm:$0xff]  ;;  %v86_v16 = vld [vmem:[%s695_s1 + $0x1f0] sm:$0xff]  ;;  %v33_v17 = vld [vmem:[%s695_s1 + $0x48] sm:$0xff] }
   0x7   :  { %166 = vmatpush.msra.mxu1 %v53_v5  ;;  %v49_v18 = vld [vmem:[%s695_s1 + $0xc8] sm:$0xff]  ;;  %204 = vmatpush.msra.mxu3 %v87_v14  ;;  %v68_v19 = vld [vmem:[%s695_s1 + $0x160] sm:$0xff]  ;;  %v67_v23 = vld [vmem:[%s695_s1 + $0x158] sm:$0xff] }
   0x8   :  { %147 = vmatpush.msra.mxu0 %v36_v6  ;;  %185 = vmatpush.msra.mxu2 %v70_v13  ;;  %v85_v20 = vld [vmem:[%s695_s1 + $0x1e8] sm:$0xff]  ;;  %v32_v21 = vld [vmem:[%s695_s1 + $0x40] sm:$0xff]  ;;  %v31_v25 = vld [vmem:[%s695_s1 + $0x38] sm:$0xff] }
   0x9   :  { %167 = vmatpush.msra.mxu1 %v52_v7  ;;  %v48_v22 = vld [vmem:[%s695_s1 + $0xc0] sm:$0xff]  ;;  %205 = vmatpush.msra.mxu3 %v86_v16  ;;  %v47_v26 = vld [vmem:[%s695_s1 + $0xb8] sm:$0xff]  ;;  %v66_v27 = vld [vmem:[%s695_s1 + $0x150] sm:$0xff] }
   0xa   :  { %148 = vmatpush.msra.mxu0 %v35_v8  ;;  %186 = vmatpush.msra.mxu2 %v69_v15  ;;  %v84_v24 = vld [vmem:[%s695_s1 + $0x1e0] sm:$0xff]  ;;  %v83_v28 = vld [vmem:[%s695_s1 + $0x1d8] sm:$0xff]  ;;  %v30_v29 = vld [vmem:[%s695_s1 + $0x30] sm:$0xff] }
   0xb   :  { %168 = vmatpush.msra.mxu1 %v51_v9  ;;  %206 = vmatpush.msra.mxu3 %v85_v20  ;;  %v46_v30 = vld [vmem:[%s695_s1 + $0xb0] sm:$0xff]  ;;  %v65_v31 = vld [vmem:[%s695_s1 + $0x148] sm:$0xff]  ;;  %v64_v35 = vld [vmem:[%s695_s1 + $0x140] sm:$0xff] }
   0xc   :  { %149 = vmatpush.msra.mxu0 %v34_v10  ;;  %187 = vmatpush.msra.mxu2 %v68_v19  ;;  %v82_v32 = vld [vmem:[%s695_s1 + $0x1d0] sm:$0xff]  ;;  %v29_v33 = vld [vmem:[%s695_s1 + $0x28] sm:$0xff]  ;;  %v28_v37 = vld [vmem:[%s695_s1 + $0x20] sm:$0xff] }
   0xd   :  { %169 = vmatpush.msra.mxu1 %v50_v12  ;;  %207 = vmatpush.msra.mxu3 %v84_v24  ;;  %v45_v34 = vld [vmem:[%s695_s1 + $0xa8] sm:$0xff]  ;;  %v44_v38 = vld [vmem:[%s695_s1 + $0xa0] sm:$0xff]  ;;  %v63_v39 = vld [vmem:[%s695_s1 + $0x138] sm:$0xff] }
   0xe   :  { %150 = vmatpush.msra.mxu0 %v33_v17  ;;  %188 = vmatpush.msra.mxu2 %v67_v23  ;;  %v81_v36 = vld [vmem:[%s695_s1 + $0x1c8] sm:$0xff]  ;;  %v80_v40 = vld [vmem:[%s695_s1 + $0x1c0] sm:$0xff]  ;;  %v27_v41 = vld [vmem:[%s695_s1 + $0x18] sm:$0xff] }
   0xf   :  { %170 = vmatpush.msra.mxu1 %v49_v18  ;;  %208 = vmatpush.msra.mxu3 %v83_v28  ;;  %v43_v42 = vld [vmem:[%s695_s1 + $0x98] sm:$0xff]  ;;  %v62_v43 = vld [vmem:[%s695_s1 + $0x130] sm:$0xff]  ;;  %v61_v47 = vld [vmem:[%s695_s1 + $0x128] sm:$0xff] }
  0x10   :  { %151 = vmatpush.msra.mxu0 %v32_v21  ;;  %189 = vmatpush.msra.mxu2 %v66_v27  ;;  %v79_v44 = vld [vmem:[%s695_s1 + $0x1b8] sm:$0xff]  ;;  %v26_v45 = vld [vmem:[%s695_s1 + $0x10] sm:$0xff]  ;;  %v25_v49 = vld [vmem:[%s695_s1 + $0x8] sm:$0xff] }
  0x11   :  { %171 = vmatpush.msra.mxu1 %v48_v22  ;;  %209 = vmatpush.msra.mxu3 %v82_v32  ;;  %v42_v46 = vld [vmem:[%s695_s1 + $0x90] sm:$0xff]  ;;  %v41_v50 = vld [vmem:[%s695_s1 + $0x88] sm:$0xff]  ;;  %v60_v51 = vld [vmem:[%s695_s1 + $0x120] sm:$0xff] }
  0x12   :  { %152 = vmatpush.msra.mxu0 %v31_v25  ;;  %190 = vmatpush.msra.mxu2 %v65_v31  ;;  %v78_v48 = vld [vmem:[%s695_s1 + $0x1b0] sm:$0xff]  ;;  %v77_v52 = vld [vmem:[%s695_s1 + $0x1a8] sm:$0xff]  ;;  %v24_v53 = vld [vmem:[%s695_s1] sm:$0xff] }
  0x13   :  { %172 = vmatpush.msra.mxu1 %v47_v26  ;;  %210 = vmatpush.msra.mxu3 %v81_v36  ;;  %v40_v54 = vld [vmem:[%s695_s1 + $0x80] sm:$0xff]  ;;  %v22_v55 = vld [vmem:[%s694_s0 + $0x8] sm:$0xff]  ;;  %v103_v56 = vld [vmem:[%s695_s1 + $0x278] sm:$0xff] }
  0x14   :  { %153 = vmatpush.msra.mxu0 %v30_v29  ;;  %191 = vmatpush.msra.mxu2 %v64_v35  ;;  %v119_v57 = vld [vmem:[%s695_s1 + $0x2f8] sm:$0xff]  ;;  %129 = vst [vmem:[#allocation1 + $0x10] ss:$2 sm:$0xff] %v22_v55  ;;  %v21_v58 = vld [vmem:[%s694_s0] sm:$0xff]  ;;  %v102_v61 = vld [vmem:[%s695_s1 + $0x270] sm:$0xff] }
  0x15   :  { %173 = vmatpush.msra.mxu1 %v46_v30  ;;  %211 = vmatpush.msra.mxu3 %v80_v40  ;;  %v59_v59 = vld [vmem:[%s695_s1 + $0x118] sm:$0xff]  ;;  %v76_v60 = vld [vmem:[%s695_s1 + $0x1a0] sm:$0xff]  ;;  %127 = vst [vmem:[#allocation1] ss:$2 sm:$0xff] %v21_v58  ;;  %v101_v62 = vld [vmem:[%s695_s1 + $0x268] sm:$0xff] }
  0x16   :  { %154 = vmatpush.msra.mxu0 %v29_v33  ;;  %192 = vmatpush.msra.mxu2 %v63_v39  ;;  %v118_v63 = vld [vmem:[%s695_s1 + $0x2f0] sm:$0xff]  ;;  %v75_v1 = vld [vmem:[%s695_s1 + $0x198] sm:$0xff]  ;;  %v117_v3 = vld [vmem:[%s695_s1 + $0x2e8] sm:$0xff] }
  0x17   :  { %174 = vmatpush.msra.mxu1 %v45_v34  ;;  %212 = vmatpush.msra.mxu3 %v79_v44  ;;  %v58_v0 = vld [vmem:[%s695_s1 + $0x110] sm:$0xff]  ;;  %v57_v4 = vld [vmem:[%s695_s1 + $0x108] sm:$0xff] }
  0x18   :  { %155 = vmatpush.msra.mxu0 %v28_v37  ;;  %193 = vmatpush.msra.mxu2 %v62_v43  ;;  %v23_v2 = vld [vmem:[%s694_s0 + $0x10] sm:$0xff] }
  0x19   :  { %175 = vmatpush.msra.mxu1 %v44_v38  ;;  %213 = vmatpush.msra.mxu3 %v78_v48  ;;  %131 = vst [vmem:[#allocation1 + $0x20] ss:$2 sm:$0xff] %v23_v2  ;;  %v74_v5 = vld [vmem:[%s695_s1 + $0x190] sm:$0xff] }
  0x1a   :  { %156 = vmatpush.msra.mxu0 %v27_v41  ;;  %194 = vmatpush.msra.mxu2 %v61_v47 }
  0x1b   :  { %176 = vmatpush.msra.mxu1 %v43_v42  ;;  %214 = vmatpush.msra.mxu3 %v77_v52 }
  0x1c   :  { %157 = vmatpush.msra.mxu0 %v26_v45  ;;  %195 = vmatpush.msra.mxu2 %v60_v51 }
  0x1d   :  { %177 = vmatpush.msra.mxu1 %v42_v46  ;;  %215 = vmatpush.msra.mxu3 %v76_v60 }
  0x1e   :  { %158 = vmatpush.msra.mxu0 %v25_v49  ;;  %196 = vmatpush.msra.mxu2 %v59_v59 }
  0x1f   :  { %178 = vmatpush.msra.mxu1 %v41_v50 }
  0x20   :  { %159 = vmatpush.msra.mxu0 %v24_v53 }
  0x21   :  { %179 = vmatpush.msra.mxu1 %v40_v54 }
  0x22   :  { %224 = vmatpush.msrb.mxu0 %v103_v56 }
  0x23   :  { %244 = vmatpush.msrb.mxu1 %v119_v57 }
  0x24   :  { %225 = vmatpush.msrb.mxu0 %v102_v61 }
  0x25   :  { %245 = vmatpush.msrb.mxu1 %v118_v63 }
  0x26   :  { %10 = vsyncpa [#allocation3], 0  ;;  %v100_v6 = vld [vmem:[%s695_s1 + $0x260] sm:$0xff]  ;;  %197 = vmatpush.msra.mxu2 %v58_v0  ;;  %216 = vmatpush.msra.mxu3 %v75_v1  ;;  %v73_v9 = vld [vmem:[%s695_s1 + $0x188] sm:$0xff]  ;;  %vm273_vm0 = vcmask 261120   ;;  %s306_s26 = sshll.u32 %s699_s5, 4  ;;  %s307_s26 = int_to_ptr.hbm [resolvable:$true] %s306_s26 }
  0x27   :  { %v116_v7 = vld [vmem:[%s695_s1 + $0x2e0] sm:$0xff]  ;;  %226 = vmatpush.msrb.mxu0 %v101_v62  ;;  %246 = vmatpush.msrb.mxu1 %v117_v3  ;;  %v99_v10 = vld [vmem:[%s695_s1 + $0x258] sm:$0xff]  ;;  %v134_v12 = vld.sshfl [vmem:[#allocation1 + $0x10] sm:$0xff pattern:$0x75316420]  ;;  %vm297_vm1 = vcmask 27648  }
  0x28   :  { %v56_v8 = vld [vmem:[%s695_s1 + $0x100] sm:$0xff]  ;;  %v115_v11 = vld [vmem:[%s695_s1 + $0x2d8] sm:$0xff]  ;;  %198 = vmatpush.msra.mxu2 %v57_v4  ;;  %217 = vmatpush.msra.mxu3 %v74_v5  ;;  %v98_v14 = vld [vmem:[%s695_s1 + $0x250] sm:$0xff] }
  0x29   :  { %227 = vmatpush.msrb.mxu0 %v100_v6  ;;  %247 = vmatpush.msrb.mxu1 %v116_v7  ;;  %v72_v13 = vld [vmem:[%s695_s1 + $0x180] sm:$0xff]  ;;  %v114_v15 = vld [vmem:[%s695_s1 + $0x2d0] sm:$0xff]  ;;  %v135_v17 = vld.sshfl [vmem:[#allocation1 + $0x18] sm:$0xff pattern:$0x75316420] }
  0x2a   :  { %199 = vmatpush.msra.mxu2 %v56_v8  ;;  %218 = vmatpush.msra.mxu3 %v73_v9  ;;  %v132_v16 = vld.sshfl [vmem:[#allocation1] sm:$0xff pattern:$0x75316420]  ;;  %v97_v18 = vld [vmem:[%s695_s1 + $0x248] sm:$0xff]  ;;  %v95_v23 = vld [vmem:[%s695_s1 + $0x238] sm:$0xff] }
  0x2b   :  { %228 = vmatpush.msrb.mxu0 %v99_v10  ;;  %248 = vmatpush.msrb.mxu1 %v115_v11  ;;  %v113_v19 = vld [vmem:[%s695_s1 + $0x2c8] sm:$0xff]  ;;  %v96_v21 = vld [vmem:[%s695_s1 + $0x240] sm:$0xff]  ;;  %v111_v24 = vld [vmem:[%s695_s1 + $0x2b8] sm:$0xff] }
  0x2c   :  { %200 = vmatmul.f32.vlgmr.msra.gmra.mxu2 %v134_v12  ;;  %219 = vmatpush.msra.mxu3 %v72_v13  ;;  %v133_v20 = vld.sshfl [vmem:[#allocation1 + $0x8] sm:$0xff pattern:$0x75316420]  ;;  %v112_v22 = vld [vmem:[%s695_s1 + $0x2c0] sm:$0xff]  ;;  %v94_v25 = vld [vmem:[%s695_s1 + $0x230] sm:$0xff] }
  0x2d   :  { %229 = vmatpush.msrb.mxu0 %v98_v14  ;;  %249 = vmatpush.msrb.mxu1 %v114_v15  ;;  %v110_v26 = vld [vmem:[%s695_s1 + $0x2b0] sm:$0xff]  ;;  %v93_v27 = vld [vmem:[%s695_s1 + $0x228] sm:$0xff]  ;;  %v92_v29 = vld [vmem:[%s695_s1 + $0x220] sm:$0xff] }
  0x2e   :  { %160 = vmatmul.f32.vlgmr.msra.gmra.mxu0 %v132_v16  ;;  %220 = vmatmul.f32.vlgmr.msra.gmra.mxu3 %v135_v17  ;;  %v109_v28 = vld [vmem:[%s695_s1 + $0x2a8] sm:$0xff]  ;;  %v108_v30 = vld [vmem:[%s695_s1 + $0x2a0] sm:$0xff]  ;;  %v91_v31 = vld [vmem:[%s695_s1 + $0x218] sm:$0xff] }
  0x2f   :  { %230 = vmatpush.msrb.mxu0 %v97_v18  ;;  %250 = vmatpush.msrb.mxu1 %v113_v19  ;;  %v107_v32 = vld [vmem:[%s695_s1 + $0x298] sm:$0xff]  ;;  %v90_v33 = vld [vmem:[%s695_s1 + $0x210] sm:$0xff]  ;;  %v89_v35 = vld [vmem:[%s695_s1 + $0x208] sm:$0xff] }
  0x30   :  { %180 = vmatmul.f32.vlgmr.msra.gmra.mxu1 %v133_v20  ;;  %v106_v34 = vld [vmem:[%s695_s1 + $0x290] sm:$0xff]  ;;  %v105_v36 = vld [vmem:[%s695_s1 + $0x288] sm:$0xff]  ;;  %v88_v37 = vld [vmem:[%s695_s1 + $0x200] sm:$0xff] }
  0x31   :  { %231 = vmatpush.msrb.mxu0 %v96_v21  ;;  %251 = vmatpush.msrb.mxu1 %v112_v22  ;;  %v104_v38 = vld [vmem:[%s695_s1 + $0x280] sm:$0xff]  ;;  %v137_v40 = vld.sshfl [vmem:[#allocation1 + $0x28] sm:$0xff pattern:$0x75316420]  ;;  %v268_v41 = vld [vmem:[%s697_s3 + $0x18] sm:$0xff] }
  0x32   :  { %v136_v39 = vld.sshfl [vmem:[#allocation1 + $0x20] sm:$0xff pattern:$0x75316420]  ;;  %289 = vmatpush.msrb.mxu2 %v268_v41  ;;  %v267_v42 = vld [vmem:[%s697_s3 + $0x10] sm:$0xff]  ;;  %v266_v43 = vld [vmem:[%s697_s3 + $0x8] sm:$0xff] }
  0x33   :  { %232 = vmatpush.msrb.mxu0 %v95_v23  ;;  %252 = vmatpush.msrb.mxu1 %v111_v24  ;;  %v265_v44 = vld [vmem:[%s697_s3] sm:$0xff] }
  0x34   :  { %290 = vmatpush.msrb.mxu2 %v267_v42  ;;  %v317_v45 = vld [vmem:[%s696_s2] ss:$0 sm:$0xff]  ;;  %s345_s2 = smov [#allocation2]  }
  0x35   :  { %233 = vmatpush.msrb.mxu0 %v94_v25  ;;  %253 = vmatpush.msrb.mxu1 %v110_v26  ;;  %v318_v59 = vld [vmem:[%s698_s4] ss:$0 sm:$0xff]  ;;  %s304_s23 = sshll.u32 %s345_s2, 4  ;;  %s305_s23 = int_to_ptr.vmem [resolvable:$true] %s304_s23 }
  0x36   :  { %291 = vmatpush.msrb.mxu2 %v266_v43 }
  0x37   :  { %234 = vmatpush.msrb.mxu0 %v93_v27  ;;  %254 = vmatpush.msrb.mxu1 %v109_v28 }
  0x38   :  { %292 = vmatpush.msrb.mxu2 %v265_v44 }
  0x39   :  { %235 = vmatpush.msrb.mxu0 %v92_v29  ;;  %255 = vmatpush.msrb.mxu1 %v108_v30 }
  0x3b   :  { %236 = vmatpush.msrb.mxu0 %v91_v31  ;;  %256 = vmatpush.msrb.mxu1 %v107_v32 }
  0x3d   :  { %237 = vmatpush.msrb.mxu0 %v90_v33  ;;  %257 = vmatpush.msrb.mxu1 %v106_v34 }
  0x3f   :  { %238 = vmatpush.msrb.mxu0 %v89_v35  ;;  %258 = vmatpush.msrb.mxu1 %v105_v36 }
  0x41   :  { %239 = vmatpush.msrb.mxu0 %v88_v37  ;;  %259 = vmatpush.msrb.mxu1 %v104_v38 }
  0x42   :  { %240 = vmatmul.f32.vlgmr.msrb.gmra.mxu0 %v136_v39  ;;  %260 = vmatmul.f32.vlgmr.msrb.gmra.mxu1 %v137_v40 }
  0xab   :  { %v161_v46 = vpop.f32.mrf.mxu0 }
  0xac   :  { %v162_v47 = vadd.f32 %v317_v45, %v161_v46 }
  0xad   :  { %v181_v48 = vpop.f32.mrf.mxu1 }
  0xae   :  { %v182_v49 = vadd.f32 %v181_v48, %v162_v47 }
  0xaf   :  { %v201_v50 = vpop.f32.mrf.mxu2 }
  0xb0   :  { %v202_v51 = vadd.f32 %v201_v50, %v182_v49 }
  0xb1   :  { %v221_v52 = vpop.f32.mrf.mxu3 }
  0xb2   :  { %v222_v53 = vadd.f32 %v221_v52, %v202_v51 }
  0xbf   :  { %v241_v54 = vpop.f32.mrf.mxu0  ;;  %v261_v55 = vpop.f32.mrf.mxu1 }
  0xc0   :  { %v242_v56 = vadd.f32 %v241_v54, %v222_v53 }
  0xc2   :  { %v262_v57 = vadd.f32 %v261_v55, %v242_v56 }
  0xc4   :  { %v264_v58 = vmax.f32 %v262_v57, 0.0 }
  0xc6   :  { %315 = vmatmul.msk.f32.vlgmr.msrb.gmra.mxu2 %vm273_vm0, %v264_v58 }
 0x149   :  { %v294_v60 = vpop.f32.mrf.mxu2 }
 0x14a   :  { %v295_v61 = vadd.f32 %v318_v59, %v294_v60 }
 0x14c   :  { %298 = vst.msk [vmem:[#allocation2] sm:$0xf] %vm297_vm1, %v295_v61 }
 0x14d   :  { %309 = dma.vmem_to_hbm [thread:$0]  %s305_s23, 64, %s307_s26, [#allocation3]  }
 0x14e   :  { %343 = dma.done.wait [#allocation3], 64  }
 0x14f   :  { %344 = vsyncadd [#allocation3], 4294967232 }
 0x150   :  { %314 = vsyncpa [#allocation3], 1 }

</bundles_post_ra>
